<compile_context>
chip_gen: v7x
topology: tpu7x:2x2x1
jax: 0.10.0
libtpu: 0.0.40
codegen_flags: <defaults>
</compile_context>

<pallas_src>
import jax
import jax.numpy as jnp
from jax.experimental import pallas as pl
from jax.experimental.pallas import tpu as pltpu


def _add_pe_kernel(x_ref, pe_ref, o_ref):
    # x_ref/o_ref: (TILE_ROWS, COLS) lane-dense tile in VMEM
    # pe_ref:      (1, COLS) row in VMEM (same block every grid step -> fetched once)
    o_ref[...] = x_ref[...] + pe_ref[...]


def learned_positional_embeddings(x: jax.Array, positional_embeddings: jax.Array) -> jax.Array:
    """x: (S, B, D); positional_embeddings: (max_len, 1, D).

    Returns x + positional_embeddings[S]  (exact spec semantics).
    """
    S, B, D = x.shape
    max_len = positional_embeddings.shape[0]
    if S >= max_len:
        raise ValueError(
            f"sequence length {S} must be < max_len {max_len}: "
            "positional_embeddings[x.shape[0]] would be out of bounds"
        )

    # Exact spec indexing: the single (1, D) row at index S.
    pe_row = positional_embeddings[S].reshape(1, D).astype(x.dtype)

    # --- Lane-dense flattening -------------------------------------------------
    if D % 128 == 0:
        # Realistic ViT widths (768/1024/...): keep D on lanes directly.
        rows, cols = S * B, D
        x2d = x.reshape(rows, cols)
        pe2d = pe_row                                    # (1, D) broadcasts per row
    elif (S * B * D) % 128 == 0 and 128 % D == 0:
        # Small D (e.g. the D=32 test): flatten to 128-wide rows; the pe pattern
        # is periodic in D along the flat index, so a lane-tiled row matches.
        cols = 128
        rows = (S * B * D) // 128
        x2d = x.reshape(rows, cols)
        pe2d = jnp.tile(pe_row, (1, 128 // D))           # (1, 128)
    else:
        # Fallback: keep the feature dim on lanes (stores may be partially masked,
        # but the kernel stays correct for any shape).
        rows, cols = S * B, D
        x2d = x.reshape(rows, cols)
        pe2d = pe_row

    # --- Tile sizing (per-generation-safe) --------------------------------------
    itemsize = jnp.dtype(x.dtype).itemsize
    sublane = {4: 8, 2: 16, 1: 32}.get(itemsize, 8)      # packed-sublane alignment
    target_tile_bytes = 2 * 1024 * 1024                  # ~2 MiB per tile
    rows_per_tile = max(1, target_tile_bytes // (cols * itemsize))
    if rows_per_tile >= rows:
        tile_rows = rows                                 # single block: full extent is legal
    else:
        tile_rows = max(sublane, (rows_per_tile // sublane) * sublane)
    grid = (pl.cdiv(rows, tile_rows),)

    out2d = pl.pallas_call(
        _add_pe_kernel,
        out_shape=jax.ShapeDtypeStruct((rows, cols), x.dtype),
        grid_spec=pltpu.PrefetchScalarGridSpec(
            num_scalar_prefetch=0,
            grid=grid,
            in_specs=[
                pl.BlockSpec((tile_rows, cols), lambda i: (i, 0)),
                pl.BlockSpec((1, cols), lambda i: (0, 0)),   # constant -> VMEM-resident
            ],
            out_specs=pl.BlockSpec((tile_rows, cols), lambda i: (i, 0)),
        ),
        compiler_params=pltpu.CompilerParams(
            dimension_semantics=("parallel",),               # shard tiles across TCs on v7x
        ),
        # If the caller can donate x, add input_output_aliases={0: 0} to do the
        # add in place and skip the separate output HBM allocation.
    )(x2d, pe2d)

    return out2d.reshape(S, B, D)


if __name__ == "__main__":
    key = jax.random.PRNGKey(0)
    k_x, k_pe = jax.random.split(key)

    d_model = 32
    max_len = 64          # small synthetic max_len (module default is 5000)
    seq_len = 8
    batch = 2

    # Module __init__ uses zeros; use deterministic random init so the kernel's
    # work is observable (shapes match the module exactly).
    positional_embeddings = jax.random.normal(k_pe, (max_len, 1, d_model), dtype=jnp.float32)
    x = jax.random.normal(k_x, (seq_len, batch, d_model), dtype=jnp.float32)

    out = learned_positional_embeddings(x, positional_embeddings)
    out = jax.block_until_ready(out)

    # Reference check (pure JAX), mirroring the PyTorch forward exactly.
    ref = x + positional_embeddings[seq_len]  # (1, D) broadcasts over (S, B, D)
    assert out.shape == (seq_len, batch, d_model)
    assert jnp.allclose(out, ref, atol=1e-6), "mismatch vs reference"

    print("KERNEL_OK")
</pallas_src>

<mosaic_0001>
module attributes {stable_mosaic.version = 11 : i64} {
  func.func @_add_pe_kernel(%arg0: i32, %arg1: memref<4x128xf32, #tpu.memory_space<vmem>>, %arg2: memref<1x128xf32, #tpu.memory_space<vmem>>, %arg3: memref<4x128xf32, #tpu.memory_space<vmem>>) attributes {dimension_semantics = [#tpu.dimension_semantics<parallel>], iteration_bounds = array<i64: 1>, scalar_prefetch = 0 : i64, scratch_operands = 0 : i64, tpu.core_type = #tpu.core_type<tc>, window_params = [{transform_indices = @transform_0, window_bounds = array<i64: 4, 128>}, {pipeline_mode = #tpu.pipeline_mode<synchronous>, transform_indices = @transform_1, window_bounds = array<i64: 1, 128>}, {transform_indices = @transform_2, window_bounds = array<i64: 4, 128>}]} {
    %c0 = arith.constant 0 : index
    %c0_0 = arith.constant 0 : index
    %0 = vector.load %arg1[%c0, %c0_0] : memref<4x128xf32, #tpu.memory_space<vmem>>, vector<4x128xf32>
    %c0_1 = arith.constant 0 : index
    %c0_2 = arith.constant 0 : index
    %1 = vector.load %arg2[%c0_1, %c0_2] : memref<1x128xf32, #tpu.memory_space<vmem>>, vector<1x128xf32>
    %2 = vector.broadcast %1 : vector<1x128xf32> to vector<4x128xf32>
    %3 = arith.addf %0, %2 : vector<4x128xf32>
    %c0_3 = arith.constant 0 : index
    %c0_4 = arith.constant 0 : index
    %4 = vector.load %arg3[%c0_3, %c0_4] : memref<4x128xf32, #tpu.memory_space<vmem>>, vector<4x128xf32>
    tpu.vector_store %arg3[%c0_3, %c0_4], %3 {strides = array<i32>} : memref<4x128xf32, #tpu.memory_space<vmem>>, vector<4x128xf32>,
    return
  }
  func.func @transform_0(%arg0: i32) -> (i32, i32) {
    %c0_i32 = arith.constant 0 : i32
    %c0_i32_0 = arith.constant 0 : i32
    return %arg0, %c0_i32 : i32, i32
  }
  func.func @transform_1(%arg0: i32) -> (i32, i32) {
    %c0_i32 = arith.constant 0 : i32
    %c0_i32_0 = arith.constant 0 : i32
    %c0_i32_1 = arith.constant 0 : i32
    return %c0_i32, %c0_i32_0 : i32, i32
  }
  func.func @transform_2(%arg0: i32) -> (i32, i32) {
    %c0_i32 = arith.constant 0 : i32
    %c0_i32_0 = arith.constant 0 : i32
    return %arg0, %c0_i32 : i32, i32
  }
}

</mosaic_0001>

<bundles_post_ra>
// kernel: tpu_custom_call.1
= control target key start
LH: loop header
LB: loop body
LE: loop exit
PB: predicated region body
PF: predicated region fallthrough
CT: control target
= control target key end

     0   :  { %7 = vsyncpa [#allocation3], 0  ;;  %s144_s0 = inlined_call_operand.hbm [shape: f32[4,128], index: 0, kind: input, shape index: {}]   ;;  %s145_s1 = inlined_call_operand.vmem [shape: f32[1,128], index: 1, kind: input, shape index: {}]   ;;  %s146_s2 = inlined_call_operand.hbm [shape: f32[4,128], index: 2, kind: output, shape index: {}]  }
   0x1   :  { %8 = vsyncpa [#allocation4], 0  ;;  %s100_s9 = smov [#allocation2]   ;;  %s52_s13 = scalar_lea.hbm %s144_s0, 64 }
   0x2   :  { %s15_s10 = sshll.u32 %s100_s9, 4  ;;  %p53_p0 = scmp.ne.s32.totalorder %s144_s0, %s52_s13  ;;  %s16_s10 = int_to_ptr.vmem [resolvable:$true] %s15_s10 }
   0x3   :  { %p56_p1 = scmp.lt.u32.totalorder %s52_s13, %s144_s0 }
   0x5   :  { %p58_p2 = pnand %p56_p1, %p53_p0 }
   0x7   :  { %61 = shalt.err (!%p58_p2)
}
   0x8   :  { %s62_s18 = scalar_lea.vmem %s16_s10, 64  ;;  %p67_p4 = scmp.lt.s32.totalorder %s16_s10, %s16_s10 }
   0x9   :  { %p63_p3 = scmp.ne.s32.totalorder %s16_s10, %s62_s18  ;;  %p68_p5 = scmp.lt.s32.totalorder %s62_s18, %s62_s18 }
   0xb   :  { %p69_p6 = por %p68_p5, %p67_p4 }
   0xd   :  { %p70_p7 = pnand %p69_p6, %p63_p3 }
   0xf   :  { %73 = shalt.err (!%p70_p7)
}
  0x10   :  { %18 = dma.hbm_to_vmem [thread:$0]  %s144_s0, 64, %s16_s10, [#allocation3]  }
  0x11   :  { %96 = dma.done.wait [#allocation3], 64  }
  0x12   :  { %97 = vsyncadd [#allocation3], 4294967232  ;;  %s101_s21 = smov [#allocation5]   ;;  %v24_v0 = vld [vmem:[#allocation2] sm:$0xf] }
  0x13   :  { %s40_s22 = sshll.u32 %s101_s21, 4  ;;  %v49_v1 = vld [vmem:[%s145_s1] ss:$0 sm:$0xff]  ;;  %s41_s22 = int_to_ptr.vmem [resolvable:$true] %s40_s22 }
  0x14   :  { %v32_v2 = vadd.f32 %v49_v1, %v24_v0  ;;  %s74_s25 = scalar_lea.vmem %s41_s22, 64  ;;  %p79_p9 = scmp.lt.s32.totalorder %s41_s22, %s41_s22 }
  0x15   :  { %p75_p8 = scmp.ne.s32.totalorder %s41_s22, %s74_s25  ;;  %p80_p10 = scmp.lt.s32.totalorder %s74_s25, %s74_s25 }
  0x16   :  { %33 = vst [vmem:[#allocation5] sm:$0xf] %v32_v2 }
  0x17   :  { %p81_p11 = por %p80_p10, %p79_p9 }
  0x19   :  { %p82_p12 = pnand %p81_p11, %p75_p8 }
  0x1b   :  { %85 = shalt.err (!%p82_p12)
}
  0x1c   :  { %s86_s27 = scalar_lea.hbm %s146_s2, 64 }
  0x1d   :  { %p87_p13 = scmp.ne.s32.totalorder %s146_s2, %s86_s27  ;;  %p90_p0 = scmp.lt.u32.totalorder %s86_s27, %s146_s2 }
  0x1f   :  { %p92_p1 = pnand %p90_p0, %p87_p13 }
  0x21   :  { %95 = shalt.err (!%p92_p1)
}
  0x22   :  { %43 = dma.vmem_to_hbm [thread:$0]  %s41_s22, 64, %s146_s2, [#allocation4]  }
  0x23   :  { %98 = dma.done.wait [#allocation4], 64  }
  0x24   :  { %99 = vsyncadd [#allocation4], 4294967232 }
  0x25   :  { %47 = vsyncpa [#allocation3], 1 }
  0x26   :  { %48 = vsyncpa [#allocation4], 1 }

</bundles_post_ra>
